<compile_context>
chip_gen: v7x
topology: tpu7x:2x2x1
jax: 0.10.0
libtpu: 0.0.40
codegen_flags: <defaults>
</compile_context>

<pallas_src>
import functools

import jax
import jax.numpy as jnp
from jax.experimental import pallas as pl
from jax.experimental.pallas import tpu as pltpu


def _round_up(x, m):
    return ((x + m - 1) // m) * m


# ----------------------------------------------------------------------------
# Shared RecGRU_W cell math (traced inside both Pallas kernels).
# ----------------------------------------------------------------------------
def _recgru_cell(X, H, L, Wxh, Bxh, Whr, Bhr, *, C, K, act):
    """One RecGRU_W cell update on VMEM-resident values.

    X   : (N, C)    bf16  node features
    H   : (N, C)    f32   previous hidden state
    L   : (N, N)    bf16  scaled Laplacian
    Wxh : (K*2C,P5) bf16  per-tap block-diag fused weights, taps stacked on rows
    Bxh : (1, P5)   f32   packed biases [b_xz|b_xr|b_xh|b_hz|b_hr|0...]
    Whr : (K*C, PC) bf16  conv_h_h per-tap weights, taps stacked on rows
    Bhr : (1, PC)   f32
    """
    cdt = X.dtype

    # Shared Chebyshev-style propagation for [X | H]: one (N,N)@(N,2C) L-matmul
    # per hop; taps are concatenated along lanes so the whole weight projection
    # is a single fat (N, K*2C) @ (K*2C, P5) MXU matmul.
    T = jnp.concatenate([X, H.astype(cdt)], axis=-1)                  # (N, 2C)
    taps = [T]
    for _ in range(1, K):
        T = jnp.dot(L, T, preferred_element_type=jnp.float32).astype(cdt)
        taps.append(T)
    T_all = taps[0] if K == 1 else jnp.concatenate(taps, axis=-1)     # (N, K*2C)

    Y = jnp.dot(T_all, Wxh, preferred_element_type=jnp.float32) + Bxh  # (N, P5) f32
    if act == "relu":
        Y = jnp.maximum(Y, 0.0)

    xz = Y[:, 0 * C:1 * C]   # conv_x_z(X)
    xr = Y[:, 1 * C:2 * C]   # conv_x_r(X)
    xh = Y[:, 2 * C:3 * C]   # conv_x_h(X)
    hz = Y[:, 3 * C:4 * C]   # conv_h_z(H)
    hr = Y[:, 4 * C:5 * C]   # conv_h_r(H)

    # Gates first so Y's bulk can die before the second propagation chain.
    Z = jax.nn.sigmoid(xz + hz)      # update gate (f32)
    R = jax.nn.sigmoid(xr + hr)      # reset gate  (f32)

    # Candidate branch: conv_h_h(H * R) needs its own propagation chain.
    # TODO(synk): optionally keep propagated taps in f32 (downcast only the
    # weight-matmul operands) when num_stacks is large / L is ill-conditioned.
    T2 = (H * R).astype(cdt)                                          # (N, C)
    taps2 = [T2]
    for _ in range(1, K):
        T2 = jnp.dot(L, T2, preferred_element_type=jnp.float32).astype(cdt)
        taps2.append(T2)
    T2_all = taps2[0] if K == 1 else jnp.concatenate(taps2, axis=-1)  # (N, K*C)

    Y2 = jnp.dot(T2_all, Whr, preferred_element_type=jnp.float32) + Bhr
    if act == "relu":
        Y2 = jnp.maximum(Y2, 0.0)

    H_tilde = jnp.tanh(xh + Y2[:, 0:C])
    return Z * H_tilde + (1.0 - Z) * H


# ----------------------------------------------------------------------------
# Kernels.
# ----------------------------------------------------------------------------
def _recgru_w_step_kernel(x_ref, h_ref, l_ref, wxh_ref, bxh_ref,
                          whr_ref, bhr_ref, out_ref, *, act, C, K):
    out_ref[...] = _recgru_cell(
        x_ref[...], h_ref[...], l_ref[...],
        wxh_ref[...], bxh_ref[...], whr_ref[...], bhr_ref[...],
        C=C, K=K, act=act)


def _recgru_w_rollout_kernel(x_ref, h0_ref, l_ref, wxh_ref, bxh_ref,
                             whr_ref, bhr_ref, out_ref, h_scr, *, act, C, K):
    t = pl.program_id(0)

    @pl.when(t == 0)
    def _():
        h_scr[...] = h0_ref[...]

    h_new = _recgru_cell(
        x_ref[0], h_scr[...], l_ref[...],
        wxh_ref[...], bxh_ref[...], whr_ref[...], bhr_ref[...],
        C=C, K=K, act=act)
    h_scr[...] = h_new
    out_ref[0] = h_new


# ----------------------------------------------------------------------------
# Timestep-invariant glue (hoisted out of the recurrent step).
# ----------------------------------------------------------------------------
def scaled_laplacian(edge_index, edge_weight, num_nodes, lambda_max=2.0):
    A = jnp.zeros((num_nodes, num_nodes), jnp.float32)
    A = A.at[edge_index[0], edge_index[1]].add(edge_weight)
    deg = A.sum(axis=1)
    d_inv_sqrt = jnp.where(deg > 0, 1.0 / jnp.sqrt(jnp.maximum(deg, 1e-12)), 0.0)
    A_norm = d_inv_sqrt[:, None] * A * d_inv_sqrt[None, :]   # 'sym' normalization
    eye = jnp.eye(num_nodes, dtype=jnp.float32)
    L = eye - A_norm
    return (2.0 / lambda_max) * L - eye


def pack_recgru_w_params(W_all, b_all):
    """(6, K, C, C), (6, 1, C) -> tap-stacked, lane-padded fused weights.

    Filter order: 0=x_z 1=h_z 2=x_r 3=h_r 4=x_h 5=h_h.
    Returns W_xh (K*2C, P5), b_xh (1, P5), W_hr (K*C, PC), b_hr (1, PC)
    with P5 = round_up(5C, 128), PC = round_up(C, 128).
    """
    K, C = W_all.shape[1], W_all.shape[2]
    P5 = _round_up(5 * C, 128)
    PC = _round_up(C, 128)

    # Per-tap block-diag (2C, 5C): X rows -> [xz|xr|xh|0|0], H rows -> [0|0|0|hz|hr].
    Wx_cat = jnp.concatenate([W_all[0], W_all[2], W_all[4]], axis=-1)   # (K, C, 3C)
    Wh_cat = jnp.concatenate([W_all[1], W_all[3]], axis=-1)             # (K, C, 2C)
    W_tap = jnp.concatenate([
        jnp.concatenate([Wx_cat, jnp.zeros((K, C, 2 * C), W_all.dtype)], axis=-1),
        jnp.concatenate([jnp.zeros((K, C, 3 * C), W_all.dtype), Wh_cat], axis=-1),
    ], axis=1)                                                          # (K, 2C, 5C)
    W_xh = jnp.pad(W_tap.reshape(K * 2 * C, 5 * C), ((0, 0), (0, P5 - 5 * C)))
    b_xh = jnp.concatenate(
        [b_all[0], b_all[2], b_all[4], b_all[1], b_all[3]], axis=-1)    # (1, 5C)
    b_xh = jnp.pad(b_xh, ((0, 0), (0, P5 - 5 * C)))

    W_hr = jnp.pad(W_all[5].reshape(K * C, C), ((0, 0), (0, PC - C)))
    b_hr = jnp.pad(b_all[5], ((0, 0), (0, PC - C)))
    return W_xh, b_xh, W_hr, b_hr


def prepare_recgru_w(edge_index, edge_weight, num_nodes, params, lambda_max=2.0):
    """Compute ALL timestep-invariant constants once per rollout."""
    W_all, b_all = params
    if edge_weight is None:
        edge_weight = jnp.ones((edge_index.shape[1],), jnp.float32)
    L = scaled_laplacian(edge_index, edge_weight, num_nodes, lambda_max)
    W_xh, b_xh, W_hr, b_hr = pack_recgru_w_params(W_all, b_all)
    return (L.astype(jnp.bfloat16),
            W_xh.astype(jnp.bfloat16), b_xh.astype(jnp.float32),
            W_hr.astype(jnp.bfloat16), b_hr.astype(jnp.float32))


def _vmem_limit_bytes(resident_bytes, tmp_bytes, pipelined_bytes=0):
    """Residency-based VMEM budget (no blanket 2x on gridless calls), capped
    at 3/4 of the device VMEM (v7x has only 64 MiB per TensorCore)."""
    try:
        cap = int(pltpu.get_tpu_info().vmem_capacity_bytes)
    except Exception:  # pragma: no cover - conservative fallback
        cap = 64 << 20
    need = resident_bytes + tmp_bytes + 2 * pipelined_bytes + (2 << 20)
    return int(min(max(need, 4 << 20), (cap * 3) // 4))


def _cell_flops(N, C, K, P5, PC):
    return (2 * (K - 1) * N * N * 2 * C      # shared [X|H] propagation hops
            + 2 * (K - 1) * N * N * C        # H*R propagation hops
            + 2 * N * (K * 2 * C) * P5       # fused weight projection
            + 2 * N * (K * C) * PC)          # H*R weight projection


def _cell_tmp_bytes(N, C, K, P5, PC):
    return (N * K * 2 * C * 2                # concatenated [X|H] taps (bf16)
            + N * P5 * 4                     # Y accumulator (f32)
            + N * K * C * 2                  # H*R taps (bf16)
            + N * PC * 4                     # Y2 accumulator (f32)
            + 8 * N * C * 4)                 # gates / slices / H_tilde etc.


# ----------------------------------------------------------------------------
# Wrappers.
# ----------------------------------------------------------------------------
def recgru_w_forward(X, H, L_b, W_xh, b_xh, W_hr, b_hr, *, act="relu"):
    """Single RecGRU_W step (matches the module forward). Returns (N, C) f32."""
    N, C = X.shape
    PC = W_hr.shape[1]
    P5 = W_xh.shape[1]
    K = W_hr.shape[0] // C

    X_b = X.astype(jnp.bfloat16)
    H_f = H.astype(jnp.float32)

    operands = (X_b, H_f, L_b, W_xh, b_xh, W_hr, b_hr)
    in_bytes = sum(int(a.size) * a.dtype.itemsize for a in operands)
    out_bytes = N * C * 4
    tmp_bytes = _cell_tmp_bytes(N, C, K, P5, PC)

    kernel = functools.partial(_recgru_w_step_kernel, act=act, C=C, K=K)
    vmem = pl.BlockSpec(memory_space=pltpu.MemorySpace.VMEM)

    return pl.pallas_call(
        kernel,
        out_shape=jax.ShapeDtypeStruct((N, C), jnp.float32),
        in_specs=[vmem] * len(operands),
        out_specs=vmem,
        input_output_aliases={1: 0},   # new H overwrites old H's buffer
        compiler_params=pltpu.CompilerParams(
            vmem_limit_bytes=_vmem_limit_bytes(in_bytes + out_bytes, tmp_bytes)),
        cost_estimate=pl.CostEstimate(
            flops=int(_cell_flops(N, C, K, P5, PC)),
            transcendentals=int(3 * N * C),
            bytes_accessed=int(in_bytes + out_bytes)),
    )(*operands)


def recgru_w_rollout(X_seq, H0, L_b, W_xh, b_xh, W_hr, b_hr, *, act="relu"):
    """T-step recurrent rollout in ONE pallas_call: grid=(T,), H carried in a
    VMEM scratch, L/weights resident across steps. Returns all hidden states
    (T, N, C) f32 (out[t] is H after consuming X_seq[t])."""
    T, N, C = X_seq.shape
    PC = W_hr.shape[1]
    P5 = W_xh.shape[1]
    K = W_hr.shape[0] // C

    X_b = X_seq.astype(jnp.bfloat16)
    H_f = H0.astype(jnp.float32)
    operands = (X_b, H_f, L_b, W_xh, b_xh, W_hr, b_hr)

    resident = (H_f, L_b, W_xh, b_xh, W_hr, b_hr)
    res_bytes = sum(int(a.size) * a.dtype.itemsize for a in resident) + N * C * 4
    step_io_bytes = N * C * 2 + N * C * 4              # per-step X block + out block
    tmp_bytes = _cell_tmp_bytes(N, C, K, P5, PC)

    grid_spec = pltpu.PrefetchScalarGridSpec(
        num_scalar_prefetch=0,
        grid=(T,),
        in_specs=[
            pl.BlockSpec((1, N, C), lambda t: (t, 0, 0)),       # X_seq[t]
            pl.BlockSpec((N, C), lambda t: (0, 0)),             # H0 (fetched once)
            pl.BlockSpec((N, N), lambda t: (0, 0)),             # L (resident)
            pl.BlockSpec(W_xh.shape, lambda t: (0, 0)),         # weights (resident)
            pl.BlockSpec(b_xh.shape, lambda t: (0, 0)),
            pl.BlockSpec(W_hr.shape, lambda t: (0, 0)),
            pl.BlockSpec(b_hr.shape, lambda t: (0, 0)),
        ],
        out_specs=pl.BlockSpec((1, N, C), lambda t: (t, 0, 0)),
        scratch_shapes=[pltpu.VMEM((N, C), jnp.float32)],        # H carry
    )

    kernel = functools.partial(_recgru_w_rollout_kernel, act=act, C=C, K=K)

    return pl.pallas_call(
        kernel,
        out_shape=jax.ShapeDtypeStruct((T, N, C), jnp.float32),
        grid_spec=grid_spec,
        compiler_params=pltpu.CompilerParams(
            dimension_semantics=("arbitrary",),      # sequential dependence via H
            vmem_limit_bytes=_vmem_limit_bytes(res_bytes, tmp_bytes,
                                               pipelined_bytes=step_io_bytes)),
        cost_estimate=pl.CostEstimate(
            flops=int(T * _cell_flops(N, C, K, P5, PC)),
            transcendentals=int(T * 3 * N * C),
            bytes_accessed=int(res_bytes + T * step_io_bytes)),
    )(*operands)


# ----------------------------------------------------------------------------
# Parameters & pure-JAX reference (f32) for correctness checking.
# ----------------------------------------------------------------------------
def init_recgru_w_params(in_channels, num_stacks=1, bias=True, seed=42):
    """Deterministic init for the 6 RecG_up filters
    (conv_x_z, conv_h_z, conv_x_r, conv_h_r, conv_x_h, conv_h_h)."""
    K = num_stacks + 1
    kw, kb = jax.random.split(jax.random.PRNGKey(seed))
    scale = 1.0 / jnp.sqrt(jnp.float32(in_channels))
    W_all = scale * jax.random.normal(kw, (6, K, in_channels, in_channels), jnp.float32)
    if bias:
        b_all = 0.01 * jax.random.normal(kb, (6, 1, in_channels), jnp.float32)
    else:
        b_all = jnp.zeros((6, 1, in_channels), jnp.float32)
    return W_all, b_all


def recgru_w_reference(X, H, L, W_all, b_all, act="relu"):
    def conv(Xin, W, b):
        K = W.shape[0]
        T = Xin
        Y = T @ W[0]
        for k in range(1, K):
            T = L @ T
            Y = Y + T @ W[k]
        Y = Y + b
        if act == "relu":
            Y = jnp.maximum(Y, 0.0)
        return Y

    Z = jax.nn.sigmoid(conv(X, W_all[0], b_all[0]) + conv(H, W_all[1], b_all[1]))
    R = jax.nn.sigmoid(conv(X, W_all[2], b_all[2]) + conv(H, W_all[3], b_all[3]))
    H_tilde = jnp.tanh(conv(X, W_all[4], b_all[4]) + conv(H * R, W_all[5], b_all[5]))
    return Z * H_tilde + (1.0 - Z) * H


# ----------------------------------------------------------------------------
# Demo
# ----------------------------------------------------------------------------
if __name__ == "__main__":
    N, C = 16, 32            # num_nodes, in_channels
    NUM_STACKS = 1
    T_STEPS = 8

    key = jax.random.PRNGKey(0)
    kx, kh, kw = jax.random.split(key, 3)

    X_seq = jax.random.normal(kx, (T_STEPS, N, C), jnp.float32)
    X = X_seq[0]
    H0 = jax.random.normal(kh, (N, C), jnp.float32)

    # Small deterministic graph: bidirected ring + a few chords.
    src = jnp.arange(N)
    dst = (src + 1) % N
    chords_s = jnp.array([0, 3, 7, 11], jnp.int32)
    chords_d = jnp.array([8, 12, 2, 5], jnp.int32)
    row = jnp.concatenate([src, dst, chords_s, chords_d])
    col = jnp.concatenate([dst, src, chords_d, chords_s])
    edge_index = jnp.stack([row, col]).astype(jnp.int32)
    edge_weight = 0.5 + jax.random.uniform(kw, (edge_index.shape[1],), jnp.float32)

    params = init_recgru_w_params(C, num_stacks=NUM_STACKS, bias=True, seed=42)
    W_all, b_all = params

    # Hoisted timestep-invariant constants (Laplacian, packed/padded bf16 weights).
    consts = prepare_recgru_w(edge_index, edge_weight, N, params, lambda_max=2.0)
    consts = jax.block_until_ready(consts)

    # Pure-JAX f32 reference for one cell update.
    L_f32 = scaled_laplacian(edge_index, edge_weight, N, 2.0)
    H_ref = jax.block_until_ready(recgru_w_reference(X, H0, L_f32, W_all, b_all))

    # Multi-timestep rollout: one pallas_call amortizes launch/fixed overhead.
    rollout = jax.jit(functools.partial(recgru_w_rollout, act="relu"))
    H_seq = jax.block_until_ready(rollout(X_seq, H0, *consts))

    # Single-step forward; H is donated so the {H -> out} alias is truly in place.
    step = jax.jit(functools.partial(recgru_w_forward, act="relu"),
                   donate_argnums=(1,))
    H_new = jax.block_until_ready(step(X, H0, *consts))

    assert H_new.shape == (N, C)
    assert H_seq.shape == (T_STEPS, N, C)
    assert bool(jnp.all(jnp.isfinite(H_new)))
    assert bool(jnp.all(jnp.isfinite(H_seq)))
    # bf16 MXU kernel vs f32 reference.
    assert float(jnp.max(jnp.abs(H_new - H_ref))) < 0.2
    # Step 0 of the rollout kernel must match the single-step kernel.
    assert float(jnp.max(jnp.abs(H_seq[0] - H_new))) < 5e-3
    print("KERNEL_OK")
</pallas_src>

<mosaic_0001>
module attributes {stable_mosaic.version = 11 : i64} {
  func.func @_recgru_w_rollout_kernel(%arg0: i32, %arg1: memref<1x16x32xbf16, #tpu.memory_space<vmem>>, %arg2: memref<16x32xf32, #tpu.memory_space<vmem>>, %arg3: memref<16x16xbf16, #tpu.memory_space<vmem>>, %arg4: memref<128x256xbf16, #tpu.memory_space<vmem>>, %arg5: memref<1x256xf32, #tpu.memory_space<vmem>>, %arg6: memref<64x128xbf16, #tpu.memory_space<vmem>>, %arg7: memref<1x128xf32, #tpu.memory_space<vmem>>, %arg8: memref<1x16x32xf32, #tpu.memory_space<vmem>>, %arg9: memref<16x32xf32, #tpu.memory_space<vmem>>) attributes {dimension_semantics = [#tpu.dimension_semantics<arbitrary>], iteration_bounds = array<i64: 8>, scalar_prefetch = 0 : i64, scratch_operands = 1 : i64, tpu.core_type = #tpu.core_type<tc>, window_params = [{transform_indices = @transform_0, window_bounds = array<i64: 1, 16, 32>}, {pipeline_mode = #tpu.pipeline_mode<synchronous>, transform_indices = @transform_1, window_bounds = array<i64: 16, 32>}, {pipeline_mode = #tpu.pipeline_mode<synchronous>, transform_indices = @transform_2, window_bounds = array<i64: 16, 16>}, {pipeline_mode = #tpu.pipeline_mode<synchronous>, transform_indices = @transform_3, window_bounds = array<i64: 128, 256>}, {pipeline_mode = #tpu.pipeline_mode<synchronous>, transform_indices = @transform_4, window_bounds = array<i64: 1, 256>}, {pipeline_mode = #tpu.pipeline_mode<synchronous>, transform_indices = @transform_5, window_bounds = array<i64: 64, 128>}, {pipeline_mode = #tpu.pipeline_mode<synchronous>, transform_indices = @transform_6, window_bounds = array<i64: 1, 128>}, {transform_indices = @transform_7, window_bounds = array<i64: 1, 16, 32>}]} {
    %c0_i32 = arith.constant 0 : i32
    %0 = arith.cmpi eq, %arg0, %c0_i32 : i32
    %1 = arith.extui %0 : i1 to i32
    %c0_i32_0 = arith.constant 0 : i32
    %2 = arith.cmpi ne, %1, %c0_i32_0 : i32
    scf.if %2 {
      %c0_28 = arith.constant 0 : index
      %c0_29 = arith.constant 0 : index
      %60 = vector.load %arg2[%c0_28, %c0_29] : memref<16x32xf32, #tpu.memory_space<vmem>>, vector<16x32xf32>
      %c0_30 = arith.constant 0 : index
      %c0_31 = arith.constant 0 : index
      %61 = vector.load %arg9[%c0_30, %c0_31] : memref<16x32xf32, #tpu.memory_space<vmem>>, vector<16x32xf32>
      tpu.vector_store %arg9[%c0_30, %c0_31], %60 {strides = array<i32>} : memref<16x32xf32, #tpu.memory_space<vmem>>, vector<16x32xf32>,
    } else {
    }
    %c0 = arith.constant 0 : index
    %c0_1 = arith.constant 0 : index
    %c0_2 = arith.constant 0 : index
    %3 = vector.load %arg1[%c0, %c0_1, %c0_2] : memref<1x16x32xbf16, #tpu.memory_space<vmem>>, vector<1x16x32xbf16>
    %4 = vector.shape_cast %3 : vector<1x16x32xbf16> to vector<16x32xbf16>
    %c0_3 = arith.constant 0 : index
    %c0_4 = arith.constant 0 : index
    %5 = vector.load %arg9[%c0_3, %c0_4] : memref<16x32xf32, #tpu.memory_space<vmem>>, vector<16x32xf32>
    %c0_5 = arith.constant 0 : index
    %c0_6 = arith.constant 0 : index
    %6 = vector.load %arg3[%c0_5, %c0_6] : memref<16x16xbf16, #tpu.memory_space<vmem>>, vector<16x16xbf16>
    %c0_7 = arith.constant 0 : index
    %c0_8 = arith.constant 0 : index
    %7 = vector.load %arg4[%c0_7, %c0_8] : memref<128x256xbf16, #tpu.memory_space<vmem>>, vector<128x256xbf16>
    %c0_9 = arith.constant 0 : index
    %c0_10 = arith.constant 0 : index
    %8 = vector.load %arg5[%c0_9, %c0_10] : memref<1x256xf32, #tpu.memory_space<vmem>>, vector<1x256xf32>
    %c0_11 = arith.constant 0 : index
    %c0_12 = arith.constant 0 : index
    %9 = vector.load %arg6[%c0_11, %c0_12] : memref<64x128xbf16, #tpu.memory_space<vmem>>, vector<64x128xbf16>
    %c0_13 = arith.constant 0 : index
    %c0_14 = arith.constant 0 : index
    %10 = vector.load %arg7[%c0_13, %c0_14] : memref<1x128xf32, #tpu.memory_space<vmem>>, vector<1x128xf32>
    %11 = arith.truncf %5 : vector<16x32xf32> to vector<16x32xbf16>
    %12 = tpu.concatenate %4, %11 in 1 : vector<16x32xbf16>, vector<16x32xbf16> -> vector<16x64xbf16>
    %cst = arith.constant dense<0.000000e+00> : vector<16x64xf32>
    %13 = tpu.matmul %6, %12, %cst {dimension_numbers = #tpu.dot_dimension_numbers<[1], [0], [0], [1], [0, 0, 1, 1], [], []>} : vector<16x16xbf16>, vector<16x64xbf16>, vector<16x64xf32> -> vector<16x64xf32>
    %14 = arith.truncf %13 : vector<16x64xf32> to vector<16x64xbf16>
    %15 = tpu.concatenate %12, %14 in 1 : vector<16x64xbf16>, vector<16x64xbf16> -> vector<16x128xbf16>
    %cst_15 = arith.constant dense<0.000000e+00> : vector<16x256xf32>
    %16 = tpu.matmul %15, %7, %cst_15 {dimension_numbers = #tpu.dot_dimension_numbers<[1], [0], [0], [1], [0, 0, 1, 1], [], []>} : vector<16x128xbf16>, vector<128x256xbf16>, vector<16x256xf32> -> vector<16x256xf32>
    %17 = vector.broadcast %8 : vector<1x256xf32> to vector<16x256xf32>
    %18 = arith.addf %16, %17 : vector<16x256xf32>
    %cst_16 = arith.constant 0.000000e+00 : f32
    %19 = vector.broadcast %cst_16 : f32 to vector<16x256xf32>
    %20 = arith.maximumf %18, %19 : vector<16x256xf32>
    %21 = vector.extract_strided_slice %20 {offsets = [0, 0], sizes = [16, 32], strides = [1, 1]} : vector<16x256xf32> to vector<16x32xf32>
    %22 = vector.extract_strided_slice %20 {offsets = [0, 32], sizes = [16, 32], strides = [1, 1]} : vector<16x256xf32> to vector<16x32xf32>
    %23 = vector.extract_strided_slice %20 {offsets = [0, 64], sizes = [16, 32], strides = [1, 1]} : vector<16x256xf32> to vector<16x32xf32>
    %24 = vector.extract_strided_slice %20 {offsets = [0, 96], sizes = [16, 32], strides = [1, 1]} : vector<16x256xf32> to vector<16x32xf32>
    %25 = vector.extract_strided_slice %20 {offsets = [0, 128], sizes = [16, 32], strides = [1, 1]} : vector<16x256xf32> to vector<16x32xf32>
    %26 = arith.addf %21, %24 : vector<16x32xf32>
    %27 = arith.negf %26 : vector<16x32xf32>
    %28 = math.exp %27 : vector<16x32xf32>
    %cst_17 = arith.constant 1.000000e+00 : f32
    %29 = vector.broadcast %cst_17 : f32 to vector<16x32xf32>
    %30 = arith.addf %29, %28 : vector<16x32xf32>
    %31 = arith.divf %29, %30 : vector<16x32xf32>
    %32 = arith.addf %22, %25 : vector<16x32xf32>
    %33 = arith.negf %32 : vector<16x32xf32>
    %34 = math.exp %33 : vector<16x32xf32>
    %cst_18 = arith.constant 1.000000e+00 : f32
    %35 = vector.broadcast %cst_18 : f32 to vector<16x32xf32>
    %36 = arith.addf %35, %34 : vector<16x32xf32>
    %37 = arith.divf %35, %36 : vector<16x32xf32>
    %38 = arith.mulf %5, %37 : vector<16x32xf32>
    %39 = arith.truncf %38 : vector<16x32xf32> to vector<16x32xbf16>
    %cst_19 = arith.constant dense<0.000000e+00> : vector<16x32xf32>
    %40 = tpu.matmul %6, %39, %cst_19 {dimension_numbers = #tpu.dot_dimension_numbers<[1], [0], [0], [1], [0, 0, 1, 1], [], []>} : vector<16x16xbf16>, vector<16x32xbf16>, vector<16x32xf32> -> vector<16x32xf32>
    %41 = arith.truncf %40 : vector<16x32xf32> to vector<16x32xbf16>
    %42 = tpu.concatenate %39, %41 in 1 : vector<16x32xbf16>, vector<16x32xbf16> -> vector<16x64xbf16>
    %cst_20 = arith.constant dense<0.000000e+00> : vector<16x128xf32>
    %43 = tpu.matmul %42, %9, %cst_20 {dimension_numbers = #tpu.dot_dimension_numbers<[1], [0], [0], [1], [0, 0, 1, 1], [], []>} : vector<16x64xbf16>, vector<64x128xbf16>, vector<16x128xf32> -> vector<16x128xf32>
    %44 = vector.broadcast %10 : vector<1x128xf32> to vector<16x128xf32>
    %45 = arith.addf %43, %44 : vector<16x128xf32>
    %cst_21 = arith.constant 0.000000e+00 : f32
    %46 = vector.broadcast %cst_21 : f32 to vector<16x128xf32>
    %47 = arith.maximumf %45, %46 : vector<16x128xf32>
    %48 = vector.extract_strided_slice %47 {offsets = [0, 0], sizes = [16, 32], strides = [1, 1]} : vector<16x128xf32> to vector<16x32xf32>
    %49 = arith.addf %23, %48 : vector<16x32xf32>
    %50 = math.tanh %49 : vector<16x32xf32>
    %51 = arith.mulf %31, %50 : vector<16x32xf32>
    %cst_22 = arith.constant 1.000000e+00 : f32
    %52 = vector.broadcast %cst_22 : f32 to vector<16x32xf32>
    %53 = arith.subf %52, %31 : vector<16x32xf32>
    %54 = arith.mulf %53, %5 : vector<16x32xf32>
    %55 = arith.addf %51, %54 : vector<16x32xf32>
    %c0_23 = arith.constant 0 : index
    %c0_24 = arith.constant 0 : index
    %56 = vector.load %arg9[%c0_23, %c0_24] : memref<16x32xf32, #tpu.memory_space<vmem>>, vector<16x32xf32>
    tpu.vector_store %arg9[%c0_23, %c0_24], %55 {strides = array<i32>} : memref<16x32xf32, #tpu.memory_space<vmem>>, vector<16x32xf32>,
    %c0_25 = arith.constant 0 : index
    %c0_26 = arith.constant 0 : index
    %c0_27 = arith.constant 0 : index
    %57 = vector.load %arg8[%c0_25, %c0_26, %c0_27] : memref<1x16x32xf32, #tpu.memory_space<vmem>>, vector<1x16x32xf32>
    %58 = vector.shape_cast %57 : vector<1x16x32xf32> to vector<16x32xf32>
    %59 = vector.shape_cast %55 : vector<16x32xf32> to vector<1x16x32xf32>
    tpu.vector_store %arg8[%c0_25, %c0_26, %c0_27], %59 {strides = array<i32>} : memref<1x16x32xf32, #tpu.memory_space<vmem>>, vector<1x16x32xf32>,
    return
  }
  func.func @transform_0(%arg0: i32) -> (i32, i32, i32) {
    %c0_i32 = arith.constant 0 : i32
    %c0_i32_0 = arith.constant 0 : i32
    %c0_i32_1 = arith.constant 0 : i32
    return %arg0, %c0_i32, %c0_i32_0 : i32, i32, i32
  }
  func.func @transform_1(%arg0: i32) -> (i32, i32) {
    %c0_i32 = arith.constant 0 : i32
    %c0_i32_0 = arith.constant 0 : i32
    %c0_i32_1 = arith.constant 0 : i32
    return %c0_i32, %c0_i32_0 : i32, i32
  }
  func.func @transform_2(%arg0: i32) -> (i32, i32) {
    %c0_i32 = arith.constant 0 : i32
    %c0_i32_0 = arith.constant 0 : i32
    %c0_i32_1 = arith.constant 0 : i32
    return %c0_i32, %c0_i32_0 : i32, i32
  }
  func.func @transform_3(%arg0: i32) -> (i32, i32) {
    %c0_i32 = arith.constant 0 : i32
    %c0_i32_0 = arith.constant 0 : i32
    %c0_i32_1 = arith.constant 0 : i32
    return %c0_i32, %c0_i32_0 : i32, i32
  }
  func.func @transform_4(%arg0: i32) -> (i32, i32) {
    %c0_i32 = arith.constant 0 : i32
    %c0_i32_0 = arith.constant 0 : i32
    %c0_i32_1 = arith.constant 0 : i32
    return %c0_i32, %c0_i32_0 : i32, i32
  }
  func.func @transform_5(%arg0: i32) -> (i32, i32) {
    %c0_i32 = arith.constant 0 : i32
    %c0_i32_0 = arith.constant 0 : i32
    %c0_i32_1 = arith.constant 0 : i32
    return %c0_i32, %c0_i32_0 : i32, i32
  }
  func.func @transform_6(%arg0: i32) -> (i32, i32) {
    %c0_i32 = arith.constant 0 : i32
    %c0_i32_0 = arith.constant 0 : i32
    %c0_i32_1 = arith.constant 0 : i32
    return %c0_i32, %c0_i32_0 : i32, i32
  }
  func.func @transform_7(%arg0: i32) -> (i32, i32, i32) {
    %c0_i32 = arith.constant 0 : i32
    %c0_i32_0 = arith.constant 0 : i32
    %c0_i32_1 = arith.constant 0 : i32
    return %arg0, %c0_i32, %c0_i32_0 : i32, i32, i32
  }
}

</mosaic_0001>

<bundles_post_ra>
// kernel: recgru_w_rollout.1
= control target key start
LH: loop header
LB: loop body
LE: loop exit
PB: predicated region body
PF: predicated region fallthrough
CT: control target
= control target key end

     0   :  { %12 = vsyncpa [#allocation4], 0  ;;  %s1350_s0 = inlined_call_operand.vmem [shape: bf16[8,16,32], index: 0, kind: input, shape index: {}]   ;;  %s1351_s1 = inlined_call_operand.vmem [shape: f32[16,32], index: 1, kind: input, shape index: {}]   ;;  %s1352_s2 = inlined_call_operand.vmem [shape: bf16[16,16], index: 2, kind: input, shape index: {}]   ;;  %s1353_s3 = inlined_call_operand.vmem [shape: bf16[128,256], index: 3, kind: input, shape index: {}]   ;;  %s1354_s4 = inlined_call_operand.vmem [shape: f32[1,256], index: 4, kind: input, shape index: {}]   ;;  %s1355_s5 = inlined_call_operand.vmem [shape: bf16[64,128], index: 5, kind: input, shape index: {}]   ;;  %s1356_s6 = inlined_call_operand.vmem [shape: f32[1,128], index: 6, kind: input, shape index: {}]   ;;  %s1357_s7 = inlined_call_operand.hbm [shape: f32[8,16,32], index: 7, kind: output, shape index: {}]  }
   0x1   :  { %14 = vsyncpa [#allocation4 + $0x1], 0  ;;  %s1103_s24 = smov 0   ;;  %s1105_s25 = smov 0  }
   0x2   :  { %s1107_s26 = smov 0   ;;  %s1109_s27 = smov 0  }
   0x3 LB: > { %s1124_s28 = sadd.s32 4294967295, %s1052_s27   ;;  %s815_s29 = sadd.s32 4294967294, %s1052_s27   ;;  %s1052_s27 = sphi %s1109_s27, %s1363_s27   ;;  %s1048_s26 = sphi %s1107_s26, %s1362_s26   ;;  %s1044_s25 = sphi %s1105_s25, %s1361_s25   ;;  %s1040_s24 = sphi %s1103_s24, %s1360_s24  }
   0x4   : > { %s1128_s30 = sadd.s32 1, %s1052_s27   ;;  %s179_s8 = sadd.s32 1, %s1048_s26 }
   0x5   : > { %s176_s9 = ssub.s32 %s1052_s27, %s1128_s30  ;;  %p189_p0 = scmp.ne.s32.totalorder %s1048_s26, %s1044_s25 }
   0x6   : > { %p177_p1 = scmp.eq.s32.totalorder %s176_s9, 0  ;;  %p190_p2 = scmp.eq.s32.totalorder %s1124_s28, 7 }
   0x7   : > { %p195_p3 = scmp.ne.s32.totalorder %s1044_s25, %s1040_s24  ;;  %p196_p4 = scmp.eq.s32.totalorder %s815_s29, 7 }
   0x8   : > { %s1139_s10 = scalar_select %p177_p1, %s1048_s26, %s179_s8  }
   0x9   : > { %p1141_p5 = por %p190_p2, %p189_p0  ;;  %p1145_p6 = por %p196_p4, %p195_p3 }
   0xa   : > { %p818_p7 = scmp.ge.s32.totalorder %s1052_s27, 1  ;;  %p240_p8 = scmp.lt.s32.totalorder %s1052_s27, 9 }
   0xc   : > { %p241_p9 = pnand %p818_p7, %p240_p8 }
   0xd   : > { %s269_s13 = sand.u32 (!%p241_p9), 1, %s1044_s25   ;;  %p272_p10 = scmp.lt.s32.totalorder (!%p241_p9), %s1124_s28, 7 }
   0xe   : > { %244 = sbr.rel (%p241_p9) target bundleno = 1782 (0x6f6), region = 48  ;;  %s819_s14 = sshll.u32 (!%p241_p9), %s269_s13, 4 }
   0xf   : > { %s1159_s20 = scalar_lea.vmem (!%p241_p9), [#allocation3], %s819_s14  ;;  %p822_p11 = scmp.ne.s32.totalorder (!%p241_p9), %s1124_s28, 0 }
  0x15   : > { %s273_s15 = scalar_select %p272_p10, %s1124_s28, 7 }
  0x16   : > { %281 = sbr.rel (%p822_p11) target bundleno = 29 (0x1d), region = 52  ;;  %v282_v0 = vld [vmem:[%s1351_s1] sm:$0xff] (!%p822_p11)  ;;  %vm284_vm0 = vcmask (!%p822_p11), 261120   ;;  %v283_v1 = vld [vmem:[%s1351_s1 + $0x8] sm:$0xff] (!%p822_p11) }
  0x17   : > { %s858_s16 = sshll.u32 %s273_s15, 3  ;;  %285 = vst.msk [vmem:[#allocation2] sm:$0xff] (!%p822_p11), %vm284_vm0, %v282_v0  ;;  %286 = vst.msk [vmem:[#allocation2 + $0x8] sm:$0xff] (!%p822_p11), %vm284_vm0, %v283_v1 }
  0x18   : > { %s276_s19 = scalar_lea.vmem %s1350_s0, %s858_s16 }
  0x1d PF: > { %v1054_v5 = vmov 0.0   ;;  %vm1055_vm1 = vmmov 0   ;;  %s1056_s8 = smov 32   ;;  %v940_v6 = vld [vmem:[%s276_s19] sm:$0xff]   ;;  %vm328_vm2 = vcmask 261120   ;;  %vm338_vm3 = vcmask 130048  }
  0x1e   : > { %v1168_v2 = vld [vmem:[#allocation2] sm:$0xff]  ;;  %v1170_v3 = vld [vmem:[#allocation2 + $0x8] sm:$0xff]  ;;  %869 = vmatprep.subr.bf16.mxu0 %v1054_v5  ;;  %871 = vmatprep.mubr.msk.bf16.mxu0 %vm1055_vm1, %v1054_v5  ;;  %v945_v12 = vld [vmem:[%s1353_s3 + $0x14] ss:$8 sps:$4 sm:$0xff]   ;;  %v1057_v26 = vmov 0   ;;  %s1058_s14 = smov 64   ;;  %v392_v34 = vlaneseq }
  0x1f   : > { %v319_v4 = vpack.c.bf16 %v1170_v3, %v1168_v2  ;;  %v1182_v9 = vld [vmem:[%s1352_s2] sm:$0xff]   ;;  %v947_v13 = vld [vmem:[%s1353_s3 + $0x10] ss:$8 sps:$4 sm:$0xff]   ;;  %v951_v16 = vld [vmem:[%s1353_s3 + $0x34] ss:$8 sps:$4 sm:$0xff]   ;;  %514 = vmatprep.mubr.bf16.mxu1 %v1057_v26  ;;  %vm387_vm4 = vcmask 523264  }
  0x20   : > { %v942_v10 = vld [vmem:[%s1353_s3 + $0x4] ss:$8 sps:$4 sm:$0xff]   ;;  %v944_v11 = vld [vmem:[%s1353_s3] ss:$8 sps:$4 sm:$0xff]   ;;  %v953_v17 = vld [vmem:[%s1353_s3 + $0x30] ss:$8 sps:$4 sm:$0xff]  }
  0x21   : > { %326 = vrot.lane.b32.xlu0 %v319_v4, %s1056_s8  ;;  %482 = vmatprep.subr.bf16.mxu1 %v942_v10  ;;  %v948_v14 = vld [vmem:[%s1353_s3 + $0x24] ss:$8 sps:$4 sm:$0xff]   ;;  %v950_v15 = vld [vmem:[%s1353_s3 + $0x20] ss:$8 sps:$4 sm:$0xff]   ;;  %v957_v20 = vld [vmem:[%s1353_s3 + $0x54] ss:$8 sps:$4 sm:$0xff]  }
  0x22   : > { %483 = vmatpush1.bf16.msra.mxu1 %v944_v11  ;;  %v954_v18 = vld [vmem:[%s1353_s3 + $0x44] ss:$8 sps:$4 sm:$0xff]   ;;  %v956_v19 = vld [vmem:[%s1353_s3 + $0x40] ss:$8 sps:$4 sm:$0xff]   ;;  %v959_v21 = vld [vmem:[%s1353_s3 + $0x50] ss:$8 sps:$4 sm:$0xff]  }
  0x23   : > { %484 = vmatprep.subr.bf16.mxu1 %v945_v12  ;;  %v960_v22 = vld [vmem:[%s1353_s3 + $0x64] ss:$8 sps:$4 sm:$0xff]   ;;  %v962_v23 = vld [vmem:[%s1353_s3 + $0x60] ss:$8 sps:$4 sm:$0xff]   ;;  %v963_v24 = vld [vmem:[%s1353_s3 + $0x74] ss:$8 sps:$4 sm:$0xff]  }
  0x24   : > { %v965_v25 = vld [vmem:[%s1353_s3 + $0x70] ss:$8 sps:$4 sm:$0xff]   ;;  %v393_v35 = vshrl.u32 %v392_v34, 7  ;;  %v309_v37 = vld [vmem:[%s1354_s4] sm:$0x3]  ;;  %s1059_s17 = smov 96  }
  0x25   : > { %v966_v10 = vld [vmem:[%s1355_s5] sm:$0xff]   ;;  %v967_v11 = vld [vmem:[%s1355_s5 + $0x8] sm:$0xff]   ;;  %v968_v12 = vld [vmem:[%s1355_s5 + $0x10] sm:$0xff]   ;;  %s1060_s23 = smov [#allocation3]  }
  0x26   : > { %485 = vmatpush1.bf16.msra.mxu1 %v947_v13  ;;  %v398_v36 = vsub.s32 1, %v393_v35  ;;  %v394_v47 = vsub.s32 0, %v393_v35  ;;  %s994_s29 = sshll.u32 %s1060_s23, 4  ;;  %s995_s29 = int_to_ptr.vmem [resolvable:$false] %s994_s29 }
  0x27   : > { %486 = vmatprep.subr.bf16.mxu1 %v948_v14  ;;  %s996_s9 = scalar_lea.vmem %s995_s29, 512 }
  0x28   : > { %v399_v38 = vrot.slane %v309_v37, %v398_v36  ;;  %v395_v48 = vrot.slane %v309_v37, %v394_v47 }
  0x2a   : > { %487 = vmatpush1.bf16.msra.mxu1 %v950_v15 }
  0x2b   : > { %488 = vmatprep.subr.bf16.mxu1 %v951_v16 }
  0x2e   : > { %489 = vmatpush1.bf16.msra.mxu1 %v953_v17 }
  0x2f   : > { %490 = vmatprep.subr.bf16.mxu1 %v954_v18 }
  0x32   : > { %491 = vmatpush1.bf16.msra.mxu1 %v956_v19 }
  0x33   : > { %492 = vmatprep.subr.bf16.mxu1 %v957_v20  ;;  %v847_v20 = vld [vmem:[%s1356_s6] ss:$0 sm:$0xff] }
  0x36   : > { %493 = vmatpush1.bf16.msra.mxu1 %v959_v21 }
  0x37   : > { %494 = vmatprep.subr.bf16.mxu1 %v960_v22 }
  0x3a   : > { %495 = vmatpush1.bf16.msra.mxu1 %v962_v23 }
  0x3b   : > { %496 = vmatprep.subr.bf16.mxu1 %v963_v24 }
  0x3e   : > { %497 = vmatpush1.bf16.msra.mxu1 %v965_v25 }
  0x93   : > { %v327_v7 = vpop.permute.xlu0 %326 }
  0x94   : > { %v331_v8 = vsel %vm328_vm2, %v940_v6, %v327_v7 }
  0x95   : > { %870 = vmatpush3.bf16.msra.mxu0 %v331_v8 }
  0x96   : > { %875 = vmatprep.subr.bf16.mxu0 %v1054_v5 }
  0x98   : > { %872 = vmatmul.mubr.msk.bf16.vlgmr.msra.gmra.mrb[0].mxu0 %vm338_vm3, %v1182_v9 }
  0x99   : > { %877 = vmatprep.mubr.msk.bf16.mxu0 %vm1055_vm1, %v1054_v5 }
 0x16b   : > { %v376_v27 = vpop.f32.mrb[0].mxu0 }
 0x16c   : > { %v873_v28 = vpop.f32.mrb[1].mxu0 }
 0x16d   : > { %v379_v29 = vpop.f32.mrb[2].mxu0 }
 0x16e   : > { %v383_v30 = vpack.c.bf16 %v379_v29, %v376_v27  ;;  %v874_v31 = vpop.f32.mrb[3].mxu0 }
 0x170   : > { %385 = vrot.lane.b32.xlu0 %v383_v30, %s1058_s14 }
 0x1e2   : > { %v386_v32 = vpop.permute.xlu0 %385 }
 0x1e3   : > { %v389_v33 = vsel %vm387_vm4, %v331_v8, %v386_v32 }
 0x1e4   : > { %515 = vmatmul.mubr.bf16.vlgmr.msra.gmra.mrb[0].mxu1 %v389_v33 }
 0x2b7   : > { %v516_v39 = vpop.f32.mrb[0].mxu1 }
 0x2b8   : > { %v518_v40 = vpop.f32.mrb[1].mxu1  ;;  %v517_v49 = vadd.f32 %v516_v39, %v395_v48 }
 0x2b9   : > { %v519_v41 = vadd.f32 %v518_v40, %v399_v38  ;;  %v520_v42 = vpop.f32.mrb[2].mxu1 }
 0x2ba   : > { %v522_v43 = vpop.f32.mrb[3].mxu1  ;;  %v1244_v50 = vmax.f32 %v517_v49, 0.0  ;;  %v521_v51 = vadd.f32 %v520_v42, %v395_v48 }
 0x2bb   : > { %v526_v44 = vmax.f32 %v519_v41, 0.0  ;;  %v523_v45 = vadd.f32 %v522_v43, %v399_v38 }
 0x2bc   : > { %v1247_v54 = vmax.f32 %v521_v51, 0.0 }
 0x2bd   : > { %553 = vrot.lane.b32.xlu1 %v526_v44, %s1056_s8  ;;  %v528_v46 = vmax.f32 %v523_v45, 0.0 }
 0x2c1   : > { %555 = vrot.lane.b32.xlu1 %v528_v46, %s1056_s8 }
 0x32f   : > { %v554_v52 = vpop.permute.xlu1 %553 }
 0x330   : > { %v559_v53 = vadd.f32 %v554_v52, %v1244_v50 }
 0x332   : > { %v844_v55 = vmul.f32 -1.442695, %v559_v53 }
 0x333   : > { %v556_v56 = vpop.permute.xlu1 %555 }
 0x334   : > { %970 = vpow2.f32 %v844_v55  ;;  %v560_v57 = vadd.f32 %v556_v56, %v1247_v54 }
 0x336   : > { %v845_v58 = vmul.f32 -1.442695, %v560_v57 }
 0x338   : > { %972 = vpow2.f32 %v845_v58 }
 0x33e   : > { %v971_v59 = vpop.eup %970 }
 0x33f   : > { %v567_v60 = vadd.f32 1.0, %v971_v59 }
 0x341   : > { %974 = vrcp.f32 %v567_v60 }
 0x342   : > { %v973_v61 = vpop.eup %972 }
 0x343   : > { %v568_v62 = vadd.f32 1.0, %v973_v61 }
 0x345   : > { %976 = vrcp.f32 %v568_v62 }
 0x34b   : > { %v975_v63 = vpop.eup %974 }
 0x34c   : > { %575 = vrot.lane.b32.xlu0 %v975_v63, %s1059_s17 }
 0x34f   : > { %v977_v0 = vpop.eup %976 }
 0x350   : > { %577 = vrot.lane.b32.xlu1 %v977_v0, %s1059_s17 }
 0x3be   : > { %v576_v1 = vpop.permute.xlu0 %575 }
 0x3bf   : > { %v581_v6 = vmul.f32 %v576_v1, %v1168_v2 }
 0x3c2   : > { %v578_v4 = vpop.permute.xlu1 %577 }
 0x3c3   : > { %v582_v7 = vmul.f32 %v578_v4, %v1170_v3 }
 0x3c5   : > { %v583_v8 = vpack.c.bf16 %v582_v7, %v581_v6 }
 0x3c7   : > { %876 = vmatpush3.bf16.msra.mxu0 %v583_v8 }
 0x3c8   : > { %881 = vmatprep.subr.bf16.mxu0 %v1054_v5 }
 0x3ca   : > { %878 = vmatmul.mubr.msk.bf16.vlgmr.msra.gmra.mrb[4].mxu0 %vm338_vm3, %v1182_v9  ;;  %v969_v9 = vld [vmem:[%s1355_s5 + $0x18] sm:$0xff]  }
 0x3cb   : > { %889 = vmatprep.mubr.msk.bf16.mxu0 %vm1055_vm1, %v1054_v5  ;;  %882 = vmatpush3.bf16.msra.mxu0 %v966_v10 }
 0x3cc   : > { %883 = vmatprep.subr.bf16.mxu0 %v1054_v5 }
 0x3cf   : > { %884 = vmatpush3.bf16.msra.mxu0 %v967_v11 }
 0x3d0   : > { %885 = vmatprep.subr.bf16.mxu0 %v1054_v5 }
 0x3d3   : > { %886 = vmatpush3.bf16.msra.mxu0 %v968_v12 }
 0x3d4   : > { %887 = vmatprep.subr.bf16.mxu0 %v1054_v5 }
 0x3d7   : > { %888 = vmatpush3.bf16.msra.mxu0 %v969_v9 }
 0x49d   : > { %v618_v13 = vpop.f32.mrb[4].mxu0 }
 0x49e   : > { %v879_v14 = vpop.f32.mrb[5].mxu0 }
 0x49f   : > { %v621_v15 = vpop.f32.mrb[6].mxu0 }
 0x4a0   : > { %v625_v16 = vpack.c.bf16 %v621_v15, %v618_v13  ;;  %v880_v17 = vpop.f32.mrb[7].mxu0 }
 0x4a2   : > { %627 = vrot.lane.b32.xlu0 %v625_v16, %s1056_s8 }
 0x514   : > { %v628_v18 = vpop.permute.xlu0 %627 }
 0x515   : > { %v631_v19 = vsel %vm328_vm2, %v583_v8, %v628_v18 }
 0x516   : > { %890 = vmatmul.mubr.msk.bf16.vlgmr.msra.gmra.mrb[8].mxu0 %vm387_vm4, %v631_v19 }
 0x5e9   : > { %v698_v21 = vpop.f32.mrb[8].mxu0 }
 0x5ea   : > { %v699_v22 = vadd.f32 %v847_v20, %v698_v21  ;;  %v891_v5 = vpop.f32.mrb[9].mxu0 }
 0x5eb   : > { %v701_v23 = vpop.f32.mrb[10].mxu0 }
 0x5ec   : > { %v705_v24 = vmax.f32 %v699_v22, 0.0  ;;  %v702_v25 = vadd.f32 %v847_v20, %v701_v23  ;;  %v892_v26 = vpop.f32.mrb[11].mxu0 }
 0x5ee   : > { %v706_v27 = vmax.f32 %v702_v25, 0.0  ;;  %709 = vrot.lane.b32.xlu1 %v705_v24, %s1058_s14 }
 0x5f0   : > { %711 = vrot.lane.b32.xlu0 %v706_v27, %s1058_s14 }
 0x5f2   : > { %531 = vrot.lane.b32.xlu1 %v1244_v50, %s1056_s8 }
 0x5f4   : > { %533 = vrot.lane.b32.xlu0 %v1247_v54, %s1056_s8  ;;  %s859_s8 = sshll.u32 %s1124_s28, 8  ;;  %s1309_s28 = scalar_lea.sflag [#allocation4], %s269_s13 }
 0x5f5   : > { %s1297_s21 = scalar_lea.hbm %s1357_s7, %s859_s8 }
 0x660   : > { %v710_v28 = vpop.permute.xlu1 %709 }
 0x661   : > { %v715_v29 = vadd.f32 %v710_v28, %v1244_v50 }
 0x662   : > { %v712_v30 = vpop.permute.xlu0 %711 }
 0x663   : > { %978 = vtanh.f32 %v715_v29  ;;  %v716_v31 = vadd.f32 %v712_v30, %v1247_v54 }
 0x664   : > { %v532_v34 = vpop.permute.xlu1 %531 }
 0x665   : > { %980 = vtanh.f32 %v716_v31  ;;  %v537_v36 = vadd.f32 %v532_v34, %v1244_v50 }
 0x666   : > { %v534_v35 = vpop.permute.xlu0 %533 }
 0x667   : > { %v538_v37 = vadd.f32 %v534_v35, %v1247_v54  ;;  %v842_v38 = vmul.f32 -1.442695, %v537_v36 }
 0x669   : > { %v843_v39 = vmul.f32 -1.442695, %v538_v37  ;;  %982 = vpow2.f32 %v842_v38 }
 0x66b   : > { %984 = vpow2.f32 %v843_v39 }
 0x66d   : > { %v979_v32 = vpop.eup %978 }
 0x66e   : > { %721 = vrot.lane.b32.xlu1 %v979_v32, %s1058_s14 }
 0x66f   : > { %v981_v33 = vpop.eup %980 }
 0x670   : > { %723 = vrot.lane.b32.xlu0 %v981_v33, %s1058_s14  ;;  %s753_s14 = sshll.u32 %s1159_s20, 4  ;;  %s1299_s14 = int_to_ptr.vmem [resolvable:$true] %s753_s14 }
 0x671   : > { %s990_s22 = scalar_lea.vmem %s1299_s14, 256  ;;  %p997_p1 = scmp.lt.s32.totalorder %s1299_s14, %s995_s29 }
 0x672   : > { %p991_p12 = scmp.ne.s32.totalorder %s1299_s14, %s990_s22  ;;  %p998_p2 = scmp.lt.s32.totalorder %s996_s9, %s990_s22 }
 0x673   : > { %v983_v40 = vpop.eup %982 }
 0x674   : > { %v545_v42 = vadd.f32 1.0, %v983_v40  ;;  %p992_p13 = pnand %p991_p12, %p1141_p5  ;;  %p999_p3 = por %p998_p2, %p997_p1 }
 0x675   : > { %v985_v41 = vpop.eup %984 }
 0x676   : > { %v546_v43 = vadd.f32 1.0, %v985_v41  ;;  %986 = vrcp.f32 %v545_v42  ;;  %p993_p0 = pneg %p992_p13 }
 0x678   : > { %988 = vrcp.f32 %v546_v43  ;;  %p1000_p4 = pnand %p999_p3, %p993_p0 }
 0x680   : > { %v987_v44 = vpop.eup %986 }
 0x681   : > { %v729_v46 = vsub.f32 1.0, %v987_v44 }
 0x682   : > { %v989_v45 = vpop.eup %988 }
 0x683   : > { %v730_v47 = vsub.f32 1.0, %v989_v45  ;;  %v731_v49 = vmul.f32 %v729_v46, %v1168_v2 }
 0x685   : > { %v732_v53 = vmul.f32 %v730_v47, %v1170_v3 }
 0x6e0   : > { %v722_v48 = vpop.permute.xlu1 %721 }
 0x6e1   : > { %v727_v50 = vmul.f32 %v987_v44, %v722_v48 }
 0x6e2   : > { %v724_v51 = vpop.permute.xlu0 %723 }
 0x6e3   : > { %v733_v52 = vadd.f32 %v731_v49, %v727_v50  ;;  %v728_v54 = vmul.f32 %v989_v45, %v724_v51 }
 0x6e5   : > { %735 = vst.msk [vmem:[#allocation2] sm:$0xff] %vm328_vm2, %v733_v52  ;;  %737 = vst.msk [vmem:[%s1159_s20] sm:$0xff] %vm328_vm2, %v733_v52  ;;  %v734_v2 = vadd.f32 %v732_v53, %v728_v54 }
 0x6e7   : > { %736 = vst.msk [vmem:[#allocation2 + $0x8] sm:$0xff] %vm328_vm2, %v734_v2  ;;  %738 = vst.msk [vmem:[%s1159_s20 + $0x8] sm:$0xff] %vm328_vm2, %v734_v2 }
 0x6e8   : > { %1003 = shalt.err (!%p1000_p4)
}
 0x6e9   : > { %s1004_s13 = scalar_lea.hbm %s1297_s21, 256  ;;  %s1008_s16 = scalar_lea.hbm %s1357_s7, 2048 }
 0x6ea   : > { %p1005_p7 = scmp.ne.s32.totalorder %s1297_s21, %s1004_s13  ;;  %p1009_p10 = scmp.lt.u32.totalorder %s1297_s21, %s1357_s7 }
 0x6eb   : > { %p1010_p11 = scmp.lt.u32.totalorder %s1008_s16, %s1004_s13  ;;  %p1012_p13 = scmp.lt.u32.totalorder %s1004_s13, %s1297_s21 }
 0x6ec   : > { %p1006_p8 = pnand %p1005_p7, %p1141_p5 }
 0x6ed   : > { %p1011_p12 = por %p1010_p11, %p1009_p10 }
 0x6ee   : > { %p1007_p9 = pneg %p1006_p8 }
 0x6ef   : > { %p1013_p0 = por %p1012_p13, %p1011_p12 }
 0x6f1   : > { %p1014_p1 = pnand %p1013_p0, %p1007_p9 }
 0x6f3   : > { %1017 = shalt.err (!%p1014_p1)
}
 0x6f4   : > { %s1061_s18 = smov 128   ;;  %s1062_s19 = smov 8  }
 0x6f5   : > { %893 = dma.vmem_to_hbm [thread:$0]  (%p1141_p5), %s1299_s14, 256, %s1297_s21, %s1309_s28, %s1061_s18, %s1061_s18, %s1062_s19  }
 0x6f6 PF: > { %p899_p2 = scmp.ge.s32.totalorder %s1052_s27, 2  ;;  %s768_s22 = sand.u32 1, %s1040_s24  }
 0x6f7   : > { %s769_s23 = scalar_lea.sflag [#allocation4], %s768_s22 }
 0x6f8   : > { %p896_p3 = pnand %p899_p2, %p1145_p6 }
 0x6fa   : > { %1035 = dma.done.wait (!%p896_p3), %s769_s23, 256  }
 0x6fb   : > { %1037 = vsyncadd (!%p896_p3), %s769_s23, 4294967040  ;;  %p17_p4 = scmp.ge.s32.totalorder %s1128_s30, 10   ;;  %s1360_s24 = smov %s1044_s25 }
 0x6fc   : > { %s1361_s25 = smov %s1048_s26  ;;  %s1362_s26 = smov %s1139_s10 }
 0x6fd   : > { %s1363_s27 = smov %s1128_s30  ;;  %19 = sbr.rel (!%p17_p4) target bundleno = 3 (0x3), region = 87 }
 0x704   :  { %774 = vsyncpa [#allocation4], 1 }
 0x705   :  { %776 = vsyncpa [#allocation4 + $0x1], 1 }

</bundles_post_ra>
